<compile_context>
chip_gen: v7x
topology: tpu7x:2x2x1
jax: 0.10.0
libtpu: 0.0.40
codegen_flags: <defaults>
</compile_context>

<pallas_src>
import jax
import jax.numpy as jnp
from jax.experimental import pallas as pl
from jax.experimental.pallas import tpu as pltpu


def _make_fold_kernel(tb, n, h):
    """compress folded into fuse: one (M, Din) x (Din, H+1) matmul."""
    hp = h + 1

    def kernel(x_ref, wf_ref, bf_ref, wp_ref, bp_ref, o_ref):
        # fused (fuse ∘ compress) matmul, f32 accumulate
        hs = jnp.dot(x_ref[0], wf_ref[...], preferred_element_type=jnp.float32)
        hs = hs + bf_ref[...]                              # (M, H+1) f32
        # regroup sublanes (layout-clean when N % 8 == 0)
        hs3 = hs.reshape(tb, n, hp)                        # (TB, N, H+1)

        # softmax over N on the folded score column (lane H)
        s = hs3[:, :, h:]                                  # (TB, N, 1)
        e = jnp.exp(s - jnp.max(s, axis=1, keepdims=True))
        denom = jnp.sum(e, axis=1)                         # (TB, 1)

        # pool over all H+1 columns; the pooled score column is killed by the
        # zero row padded onto wp, so no lane-unaligned hs[:, :H] slice needed
        pooled = jnp.sum(e * hs3, axis=1)                  # (TB, H+1) f32
        pooled = pooled * pl.reciprocal(denom, approx=True)

        out = jnp.dot(pooled, wp_ref[...], preferred_element_type=jnp.float32)
        o_ref[...] = (out + bp_ref[...])[None].astype(o_ref.dtype)

    return kernel


def _make_nofold_kernel(tb, n, h):
    """H % 128 == 0 guard (v5e): score via XLU lane reduction, no folded column."""

    def kernel(x_ref, wf_ref, bf_ref, wc_ref, wp_ref, bp_ref, o_ref):
        hs = jnp.dot(x_ref[0], wf_ref[...], preferred_element_type=jnp.float32)
        hs = hs + bf_ref[...]                              # (M, H) f32
        hs3 = hs.reshape(tb, n, h)                         # (TB, N, H)

        # compress score as a lane reduction; the scalar bias bc is a constant
        # shift of every logit and cancels in the softmax over N.
        s = jnp.sum(hs3 * wc_ref[...].reshape(1, 1, h), axis=-1, keepdims=True)
        e = jnp.exp(s - jnp.max(s, axis=1, keepdims=True))
        denom = jnp.sum(e, axis=1)                         # (TB, 1)

        pooled = jnp.sum(e * hs3, axis=1)                  # (TB, H)
        pooled = pooled * pl.reciprocal(denom, approx=True)

        out = jnp.dot(pooled, wp_ref[...], preferred_element_type=jnp.float32)
        o_ref[...] = (out + bp_ref[...])[None].astype(o_ref.dtype)

    return kernel


def _pick_batch_tile(b, n, din, h_cols, o, x_bytes, w_bytes,
                     vmem_budget=40 << 20, target_rows=1024):
    """Pick TB dividing B: big enough that M = TB*N passes the ~512-1024-row
    pipeline-overhead knee, small enough to fit the VMEM budget, preferring
    G = B//TB >= 2 so v7x's two TensorCores both get work."""

    def cost(tb):
        m = tb * n
        act = 2 * m * din * x_bytes                        # double-buffered input block
        wts = 2 * (din * h_cols * w_bytes + h_cols * 4 + h_cols * o * 4 + o * 4)
        out = 2 * tb * o * 4
        tmp = 3 * m * h_cols * 4                           # f32 matmul result + temps
        return act + wts + out + tmp

    divs = [d for d in range(1, b + 1) if b % d == 0]
    fits = [d for d in divs if cost(d) <= vmem_budget] or divs[:1]
    multi = [d for d in fits if b // d >= 2] or fits       # keep both TCs busy (v7x)
    big_enough = [d for d in multi if d * n >= target_rows]
    # smallest tile past the knee keeps the grid long (megacore); otherwise the
    # largest tile that fits gets closest to the knee.
    return min(big_enough) if big_enough else max(multi)


def global_feature(inps, params, batch_tile=None, matmul_dtype=jnp.bfloat16):
    """inps: list of k arrays (B, N, dim_i); params: (wf, bf, wc, bc, wp, bp)
    with weights stored as (in_features, out_features)."""
    k = len(inps)
    B, N, _ = inps[0].shape
    dims = [a.shape[2] for a in inps]

    wf, bf, wc, bc, wp, bp = params
    Din, H = wf.shape
    O = wp.shape[1]
    assert sum(dims) == Din

    # Single wrapper-side concat + batch/seq flatten -> one K=Din matmul with a
    # layout-clean (M, Din) operand; no in-kernel reshape of the activations.
    x = jnp.concatenate(inps, axis=2).reshape(B * N, Din)

    # Fold compress into fuse unless the extra column would open a new 128-lane
    # MXU output tile (v5e guard when H % 128 == 0).
    fold = (H % 128) != 0
    if fold:
        # Folded score column / bias built in f32 before any bf16 cast.
        wf_mm = jnp.concatenate([wf, wf @ wc], axis=1)                       # (Din, H+1)
        bf_mm = jnp.concatenate([bf, bf @ wc + bc], axis=1)                  # (1,  H+1)
        wp_mm = jnp.concatenate([wp, jnp.zeros((1, O), wp.dtype)], axis=0)  # (H+1, O)
        h_cols = H + 1
    else:
        wf_mm, bf_mm, wp_mm, h_cols = wf, bf, wp, H
    wc_row = wc.T                                                            # (1, H) f32

    if matmul_dtype is not None:
        # bf16 matmul operands halve HBM traffic; accumulate + elementwise stay f32.
        x = x.astype(matmul_dtype)
        wf_mm = wf_mm.astype(matmul_dtype)
        # post weights / biases stay f32 (tiny; keeps softmax + post matmul precise)

    TB = batch_tile if batch_tile is not None else _pick_batch_tile(
        B, N, Din, h_cols, O, x.dtype.itemsize, wf_mm.dtype.itemsize)
    assert B % TB == 0, "batch tile must divide B"
    G = B // TB
    M = TB * N

    # Present activations as (G, M, Din): block = full last-two dims, so the
    # (8,128) rule holds for any TB/N and the kernel needs no reshape.
    x = x.reshape(G, M, Din)

    x_spec = pl.BlockSpec((1, M, Din), lambda b: (b, 0, 0))
    wf_spec = pl.BlockSpec((Din, h_cols), lambda b: (0, 0))
    bf_spec = pl.BlockSpec((1, h_cols), lambda b: (0, 0))
    wp_spec = pl.BlockSpec((h_cols, O), lambda b: (0, 0))
    bp_spec = pl.BlockSpec((1, O), lambda b: (0, 0))

    if fold:
        kernel = _make_fold_kernel(TB, N, H)
        in_specs = [x_spec, wf_spec, bf_spec, wp_spec, bp_spec]
        args = (x, wf_mm, bf_mm, wp_mm, bp)
    else:
        kernel = _make_nofold_kernel(TB, N, H)
        wc_spec = pl.BlockSpec((1, H), lambda b: (0, 0))
        in_specs = [x_spec, wf_spec, bf_spec, wc_spec, wp_spec, bp_spec]
        args = (x, wf_mm, bf_mm, wc_row, wp_mm, bp)

    out = pl.pallas_call(
        kernel,
        out_shape=jax.ShapeDtypeStruct((G, TB, O), inps[0].dtype),
        grid=(G,),
        in_specs=in_specs,
        out_specs=pl.BlockSpec((1, TB, O), lambda b: (b, 0, 0)),
        compiler_params=pltpu.CompilerParams(
            dimension_semantics=("parallel",),
            vmem_limit_bytes=48 * 1024 * 1024),
    )(*args)
    return out.reshape(B, O)


def global_feature_reference(inps, params):
    """Pure-JAX f32 reference mirroring the PyTorch forward."""
    wf, bf, wc, bc, wp, bp = params
    x = jnp.concatenate(inps, axis=2)
    h = x @ wf + bf                                   # (B, N, H)
    s = h @ wc + bc                                   # (B, N, 1)
    a = jax.nn.softmax(s, axis=1)                     # softmax over dim=1
    pooled = jnp.sum(a * h, axis=1)                   # (B, H)
    return pooled @ wp + bp                           # (B, O)


def init_params(key, dim_i, dim_hid, dim_out, k):
    """Deterministic synthetic weights; stored as (in, out) == W^T of PyTorch."""
    d_in = dim_i * k
    k1, k2, k3, k4, k5, k6 = jax.random.split(key, 6)

    def lin(kw, kb, fin, fout):
        bound = 1.0 / jnp.sqrt(fin)
        w = jax.random.uniform(kw, (fin, fout), jnp.float32, -bound, bound)
        b = jax.random.uniform(kb, (1, fout), jnp.float32, -bound, bound)
        return w, b

    wf, bf = lin(k1, k2, d_in, dim_hid)
    wc, bc = lin(k3, k4, dim_hid, 1)
    wp, bp = lin(k5, k6, dim_hid, dim_out)
    return wf, bf, wc, bc, wp, bp


if __name__ == "__main__":
    # Small shapes consistent with the module's forward
    B, N = 2, 8            # batch, sequence (dim=1 softmax axis)
    dim_i, k = 16, 4       # per-input feature dim, number of inputs
    dim_hid, dim_out = 32, 16

    key = jax.random.PRNGKey(0)
    kp, *kxs = jax.random.split(key, 1 + k)

    params = init_params(kp, dim_i, dim_hid, dim_out, k)
    inps = [jax.random.normal(kx, (B, N, dim_i), jnp.float32) for kx in kxs]

    out = global_feature(inps, params)          # bf16 matmul operands by default
    out = jax.block_until_ready(out)

    ref = global_feature_reference(inps, params)
    assert out.shape == (B, dim_out)
    # tolerance accounts for bf16 matmul operands + approx (EUP) reciprocal
    assert jnp.allclose(out, ref, atol=3e-2, rtol=3e-2), "mismatch vs reference"

    # exact-precision path (f32 operands) should match tightly as well
    out_f32 = jax.block_until_ready(global_feature(inps, params, matmul_dtype=None))
    assert jnp.allclose(out_f32, ref, atol=5e-3, rtol=5e-3), "f32 path mismatch"

    print("KERNEL_OK")
</pallas_src>

<mosaic_0001>
module attributes {stable_mosaic.version = 11 : i64} {
  func.func @kernel(%arg0: i32, %arg1: memref<1x8x64xbf16, #tpu.memory_space<vmem>>, %arg2: memref<64x33xbf16, #tpu.memory_space<vmem>>, %arg3: memref<1x33xf32, #tpu.memory_space<vmem>>, %arg4: memref<33x16xf32, #tpu.memory_space<vmem>>, %arg5: memref<1x16xf32, #tpu.memory_space<vmem>>, %arg6: memref<1x1x16xf32, #tpu.memory_space<vmem>>) attributes {dimension_semantics = [#tpu.dimension_semantics<parallel>], iteration_bounds = array<i64: 2>, scalar_prefetch = 0 : i64, scratch_operands = 0 : i64, tpu.core_type = #tpu.core_type<tc>, window_params = [{transform_indices = @transform_0, window_bounds = array<i64: 1, 8, 64>}, {pipeline_mode = #tpu.pipeline_mode<synchronous>, transform_indices = @transform_1, window_bounds = array<i64: 64, 33>}, {pipeline_mode = #tpu.pipeline_mode<synchronous>, transform_indices = @transform_2, window_bounds = array<i64: 1, 33>}, {pipeline_mode = #tpu.pipeline_mode<synchronous>, transform_indices = @transform_3, window_bounds = array<i64: 33, 16>}, {pipeline_mode = #tpu.pipeline_mode<synchronous>, transform_indices = @transform_4, window_bounds = array<i64: 1, 16>}, {transform_indices = @transform_5, window_bounds = array<i64: 1, 1, 16>}]} {
    %c0 = arith.constant 0 : index
    %c0_0 = arith.constant 0 : index
    %c0_1 = arith.constant 0 : index
    %0 = vector.load %arg1[%c0, %c0_0, %c0_1] : memref<1x8x64xbf16, #tpu.memory_space<vmem>>, vector<1x8x64xbf16>
    %1 = vector.shape_cast %0 : vector<1x8x64xbf16> to vector<8x64xbf16>
    %c0_2 = arith.constant 0 : index
    %c0_3 = arith.constant 0 : index
    %2 = vector.load %arg2[%c0_2, %c0_3] : memref<64x33xbf16, #tpu.memory_space<vmem>>, vector<64x33xbf16>
    %cst = arith.constant dense<0.000000e+00> : vector<8x33xf32>
    %3 = tpu.matmul %1, %2, %cst {dimension_numbers = #tpu.dot_dimension_numbers<[1], [0], [0], [1], [0, 0, 1, 1], [], []>} : vector<8x64xbf16>, vector<64x33xbf16>, vector<8x33xf32> -> vector<8x33xf32>
    %c0_4 = arith.constant 0 : index
    %c0_5 = arith.constant 0 : index
    %4 = vector.load %arg3[%c0_4, %c0_5] : memref<1x33xf32, #tpu.memory_space<vmem>>, vector<1x33xf32>
    %5 = vector.broadcast %4 : vector<1x33xf32> to vector<8x33xf32>
    %6 = arith.addf %3, %5 : vector<8x33xf32>
    %7 = vector.shape_cast %6 : vector<8x33xf32> to vector<1x8x33xf32>
    %8 = vector.extract_strided_slice %7 {offsets = [0, 0, 32], sizes = [1, 8, 1], strides = [1, 1, 1]} : vector<1x8x33xf32> to vector<1x8x1xf32>
    %cst_6 = arith.constant dense<0xFF800000> : vector<1x1xf32>
    %9 = vector.multi_reduction <maximumf>, %8, %cst_6 [1] : vector<1x8x1xf32> to vector<1x1xf32>
    %10 = vector.shape_cast %9 : vector<1x1xf32> to vector<1x1x1xf32>
    %11 = vector.broadcast %10 : vector<1x1x1xf32> to vector<1x8x1xf32>
    %12 = arith.subf %8, %11 : vector<1x8x1xf32>
    %13 = math.exp %12 : vector<1x8x1xf32>
    %cst_7 = arith.constant dense<0.000000e+00> : vector<1x1xf32>
    %14 = vector.multi_reduction <add>, %13, %cst_7 [1] : vector<1x8x1xf32> to vector<1x1xf32>
    %15 = vector.broadcast %13 : vector<1x8x1xf32> to vector<1x8x33xf32>
    %16 = arith.mulf %15, %7 : vector<1x8x33xf32>
    %cst_8 = arith.constant dense<0.000000e+00> : vector<1x33xf32>
    %17 = vector.multi_reduction <add>, %16, %cst_8 [1] : vector<1x8x33xf32> to vector<1x33xf32>
    %18 = tpu.reciprocal %14 {approx = true} : vector<1x1xf32> -> vector<1x1xf32>
    %19 = vector.broadcast %18 : vector<1x1xf32> to vector<1x33xf32>
    %20 = arith.mulf %17, %19 : vector<1x33xf32>
    %c0_9 = arith.constant 0 : index
    %c0_10 = arith.constant 0 : index
    %21 = vector.load %arg4[%c0_9, %c0_10] : memref<33x16xf32, #tpu.memory_space<vmem>>, vector<33x16xf32>
    %cst_11 = arith.constant dense<0.000000e+00> : vector<1x16xf32>
    %22 = tpu.matmul %20, %21, %cst_11 {dimension_numbers = #tpu.dot_dimension_numbers<[1], [0], [0], [1], [0, 0, 1, 1], [], []>} : vector<1x33xf32>, vector<33x16xf32>, vector<1x16xf32> -> vector<1x16xf32>
    %c0_12 = arith.constant 0 : index
    %c0_13 = arith.constant 0 : index
    %23 = vector.load %arg5[%c0_12, %c0_13] : memref<1x16xf32, #tpu.memory_space<vmem>>, vector<1x16xf32>
    %24 = arith.addf %22, %23 : vector<1x16xf32>
    %25 = vector.shape_cast %24 : vector<1x16xf32> to vector<1x1x16xf32>
    %c0_14 = arith.constant 0 : index
    %c0_15 = arith.constant 0 : index
    %c0_16 = arith.constant 0 : index
    %26 = vector.load %arg6[%c0_14, %c0_15, %c0_16] : memref<1x1x16xf32, #tpu.memory_space<vmem>>, vector<1x1x16xf32>
    tpu.vector_store %arg6[%c0_14, %c0_15, %c0_16], %25 {strides = array<i32>} : memref<1x1x16xf32, #tpu.memory_space<vmem>>, vector<1x1x16xf32>,
    return
  }
  func.func @transform_0(%arg0: i32) -> (i32, i32, i32) {
    %c0_i32 = arith.constant 0 : i32
    %c0_i32_0 = arith.constant 0 : i32
    %c0_i32_1 = arith.constant 0 : i32
    return %arg0, %c0_i32, %c0_i32_0 : i32, i32, i32
  }
  func.func @transform_1(%arg0: i32) -> (i32, i32) {
    %c0_i32 = arith.constant 0 : i32
    %c0_i32_0 = arith.constant 0 : i32
    %c0_i32_1 = arith.constant 0 : i32
    return %c0_i32, %c0_i32_0 : i32, i32
  }
  func.func @transform_2(%arg0: i32) -> (i32, i32) {
    %c0_i32 = arith.constant 0 : i32
    %c0_i32_0 = arith.constant 0 : i32
    %c0_i32_1 = arith.constant 0 : i32
    return %c0_i32, %c0_i32_0 : i32, i32
  }
  func.func @transform_3(%arg0: i32) -> (i32, i32) {
    %c0_i32 = arith.constant 0 : i32
    %c0_i32_0 = arith.constant 0 : i32
    %c0_i32_1 = arith.constant 0 : i32
    return %c0_i32, %c0_i32_0 : i32, i32
  }
  func.func @transform_4(%arg0: i32) -> (i32, i32) {
    %c0_i32 = arith.constant 0 : i32
    %c0_i32_0 = arith.constant 0 : i32
    %c0_i32_1 = arith.constant 0 : i32
    return %c0_i32, %c0_i32_0 : i32, i32
  }
  func.func @transform_5(%arg0: i32) -> (i32, i32, i32) {
    %c0_i32 = arith.constant 0 : i32
    %c0_i32_0 = arith.constant 0 : i32
    %c0_i32_1 = arith.constant 0 : i32
    return %arg0, %c0_i32, %c0_i32_0 : i32, i32, i32
  }
}

</mosaic_0001>

<bundles_post_ra>
// kernel: tpu_custom_call.1
= control target key start
LH: loop header
LB: loop body
LE: loop exit
PB: predicated region body
PF: predicated region fallthrough
CT: control target
= control target key end

     0   :  { %10 = vsyncpa [#allocation3], 0  ;;  %s840_s0 = inlined_call_operand.vmem [shape: bf16[2,8,64], index: 0, kind: input, shape index: {}]   ;;  %s841_s1 = inlined_call_operand.vmem [shape: bf16[64,33], index: 1, kind: input, shape index: {}]   ;;  %s842_s2 = inlined_call_operand.vmem [shape: f32[1,33], index: 2, kind: input, shape index: {}]   ;;  %s843_s3 = inlined_call_operand.vmem [shape: f32[33,16], index: 3, kind: input, shape index: {}]   ;;  %s844_s4 = inlined_call_operand.vmem [shape: f32[1,16], index: 4, kind: input, shape index: {}]   ;;  %s845_s5 = inlined_call_operand.hbm [shape: f32[2,1,16], index: 5, kind: output, shape index: {}]  }
   0x1   :  { %12 = vsyncpa [#allocation3 + $0x1], 0  ;;  %s705_s18 = smov 0   ;;  %s707_s19 = smov 0  }
   0x2   :  { %s709_s20 = smov 0   ;;  %s711_s21 = smov 0  }
   0x3 LB: > { %s726_s22 = sadd.s32 4294967295, %s668_s21   ;;  %s496_s23 = sadd.s32 4294967294, %s668_s21   ;;  %s668_s21 = sphi %s711_s21, %s851_s21   ;;  %s664_s20 = sphi %s709_s20, %s850_s20   ;;  %s660_s19 = sphi %s707_s19, %s849_s19   ;;  %s656_s18 = sphi %s705_s18, %s848_s18  }
   0x4   : > { %s730_s24 = sadd.s32 1, %s668_s21   ;;  %s135_s25 = sadd.s32 1, %s664_s20 }
   0x5   : > { %s132_s26 = ssub.s32 %s668_s21, %s730_s24  ;;  %p145_p0 = scmp.ne.s32.totalorder %s664_s20, %s660_s19 }
   0x6   : > { %p133_p1 = scmp.eq.s32.totalorder %s132_s26, 0  ;;  %p146_p2 = scmp.eq.s32.totalorder %s726_s22, 1 }
   0x7   : > { %p151_p3 = scmp.ne.s32.totalorder %s660_s19, %s656_s18  ;;  %p152_p4 = scmp.eq.s32.totalorder %s496_s23, 1 }
   0x8   : > { %s741_s27 = scalar_select %p133_p1, %s664_s20, %s135_s25  }
   0x9   : > { %p743_p5 = por %p146_p2, %p145_p0  ;;  %p747_p6 = por %p152_p4, %p151_p3 }
   0xa   : > { %p499_p7 = scmp.ge.s32.totalorder %s668_s21, 1  ;;  %p189_p8 = scmp.lt.s32.totalorder %s668_s21, 3 }
   0xc   : > { %p190_p9 = pnand %p499_p7, %p189_p8 }
   0xd   : > { %v598_v0 = vld [vmem:[%s841_s1] sm:$0xff] (!%p190_p9)   ;;  %v670_v1 = vmov (!%p190_p9), 0.0   ;;  %v599_v2 = vld [vmem:[%s841_s1 + $0x8] sm:$0xff] (!%p190_p9)   ;;  %vm671_vm0 = vmmov (!%p190_p9), 0   ;;  %p215_p10 = scmp.lt.s32.totalorder (!%p190_p9), %s726_s22, 1  ;;  %v600_v3 = vld [vmem:[%s841_s1 + $0x10] sm:$0xff] (!%p190_p9)  }
   0xe   : > { %193 = sbr.rel (%p190_p9) target bundleno = 654 (0x28e), region = 40  ;;  %523 = vmatprep.subr.bf16.mxu0 (!%p190_p9), %v670_v1  ;;  %531 = vmatprep.mubr.msk.bf16.mxu0 (!%p190_p9), %vm671_vm0, %v670_v1  ;;  %v601_v4 = vld [vmem:[%s841_s1 + $0x18] sm:$0xff] (!%p190_p9)   ;;  %vm260_vm1 = vcmask (!%p190_p9), 523264   ;;  %v672_v6 = vmov (!%p190_p9), 32   ;;  %v501_v7 = vld [vmem:[%s842_s2] ss:$0 sm:$0xff] (!%p190_p9) }
   0xf   : > { %524 = vmatpush3.bf16.msra.mxu0 (!%p190_p9), %v598_v0  ;;  %545 = vmatprep.mubr.msk.f32.mxu1 (!%p190_p9), %vm671_vm0, %v670_v1  ;;  %vm304_vm2 = vcmask (!%p190_p9), 269568   ;;  %v343_v28 = vld [vmem:[%s843_s3] sm:$0xff] (!%p190_p9)  ;;  %v344_v29 = vld [vmem:[%s843_s3 + $0x8] sm:$0xff] (!%p190_p9)  ;;  %v345_v30 = vld [vmem:[%s843_s3 + $0x10] sm:$0xff] (!%p190_p9)  ;;  %v673_v31 = vmov (!%p190_p9), 0.0|0.0   ;;  %vm352_vm3 = vcmask (!%p190_p9), 1040384  }
  0x10   : > { %525 = vmatprep.subr.bf16.mxu0 (!%p190_p9), %v670_v1  ;;  %597 = vset.pattern.permute.xlu0 (!%p190_p9), %v672_v6  ;;  %v549_v32 = vpack.c.bf16 (!%p190_p9), %v344_v29, %v343_v28  ;;  %v346_v33 = vld [vmem:[%s843_s3 + $0x18] sm:$0xff] (!%p190_p9)  ;;  %v347_v38 = vld [vmem:[%s843_s3 + $0x20] sm:$0x1] (!%p190_p9)  ;;  %vm328_vm4 = vcmask (!%p190_p9), 269312   ;;  %s213_s14 = sand.u32 (!%p190_p9), 1, %s660_s19   ;;  %vm426_vm5 = vcmask (!%p190_p9), 122880  }
  0x11   : > { %548 = vmatprep.subr.bf16.mxu1 (!%p190_p9), %v673_v31  ;;  %v552_v35 = vpack.c.bf16 (!%p190_p9), %v346_v33, %v345_v30  ;;  %v348_v50 = vld [vmem:[%s844_s4] sm:$0x1] (!%p190_p9)  ;;  %s214_s23 = scalar_lea.vmem (!%p190_p9), [#allocation2], %s213_s14  ;;  %s429_s7 = scalar_lea.sflag (!%p190_p9), [#allocation3], %s213_s14 }
  0x12   : > { %550 = vmatpush3.bf16.msra.mxu1 (!%p190_p9), %v549_v32  ;;  %s441_s25 = sshll.u32 (!%p190_p9), %s214_s23, 4  ;;  %s800_s25 = int_to_ptr.vmem [resolvable:$true] %s441_s25 }
  0x13   : > { %526 = vmatpush3.bf16.msra.mxu0 (!%p190_p9), %v599_v2  ;;  %551 = vmatprep.subr.bf16.mxu1 (!%p190_p9), %v673_v31  ;;  %s606_s8 = scalar_lea.vmem (!%p190_p9), %s800_s25, 16 }
  0x14   : > { %527 = vmatprep.subr.bf16.mxu0 (!%p190_p9), %v670_v1  ;;  %p607_p11 = scmp.ne.s32.totalorder (!%p190_p9), %s800_s25, %s606_s8 }
  0x15   : > { %s216_s9 = scalar_select %p215_p10, %s726_s22, 1 }
  0x16   : > { %553 = vmatpush3.bf16.msra.mxu1 %v552_v35  ;;  %p608_p12 = pnand %p607_p11, %p743_p5 }
  0x17   : > { %s500_s12 = sshll.u32 %s216_s9, 2  ;;  %528 = vmatpush3.bf16.msra.mxu0 %v600_v3  ;;  %543 = vmatprep.subr.mxu1 %v670_v1 }
  0x18   : > { %529 = vmatprep.subr.bf16.mxu0 %v670_v1  ;;  %s218_s17 = scalar_lea.vmem %s840_s0, %s500_s12  ;;  %p609_p13 = pneg %p608_p12 }
  0x19   : > { %v220_v5 = vld [vmem:[%s218_s17] sm:$0xf]  ;;  %s509_s17 = sshll.u32 %s726_s22, 4  ;;  %s674_s22 = smov [#allocation2]  }
  0x1a   : > { %544 = vmatpush3.msk.msra.mxu1 %vm352_vm3, %v347_v38  ;;  %s798_s6 = scalar_lea.hbm %s845_s5, %s509_s17  ;;  %s610_s9 = sshll.u32 %s674_s22, 4  ;;  %s611_s9 = int_to_ptr.vmem [resolvable:$false] %s610_s9 }
  0x1b   : > { %530 = vmatpush3.bf16.msra.mxu0 %v601_v4  ;;  %s612_s10 = scalar_lea.vmem %s611_s9, 32  ;;  %p613_p0 = scmp.lt.s32.totalorder %s800_s25, %s611_s9 }
  0x1c   : > { %p614_p1 = scmp.lt.s32.totalorder %s612_s10, %s606_s8 }
  0x1e   : > { %532 = vmatmul.mubr.msk.bf16.vlgmr.msra.gmra.mrb[0].mxu0 %vm260_vm1, %v220_v5  ;;  %p615_p2 = por %p614_p1, %p613_p0 }
  0x20   : > { %p616_p3 = pnand %p615_p2, %p609_p13 }
  0xf1   : > { %v298_v8 = vpop.f32.mrb[0].mxu0 }
  0xf2   : > { %v299_v9 = vadd.f32 %v501_v7, %v298_v8  ;;  %v533_v10 = vpop.f32.mrb[1].mxu0 }
  0xf3   : > { %v301_v11 = vpop.f32.mrb[2].mxu0 }
  0xf4   : > { %v305_v12 = vsel %vm304_vm2, %v299_v9, -inf  ;;  %v534_v13 = vpop.f32.mrb[3].mxu0 }
  0xf5   : > { %v306_v14 = vrot.slane %v305_v12, 4 }
  0xf7   : > { %v307_v15 = vmax.f32 %v305_v12, %v306_v14 }
  0xf9   : > { %v308_v16 = vrot.slane %v307_v15, 2 }
  0xfb   : > { %v309_v17 = vmax.f32 %v307_v15, %v308_v16 }
  0xfd   : > { %v310_v18 = vrot.slane %v309_v17, 1 }
  0xff   : > { %v311_v19 = vmax.f32 %v309_v17, %v310_v18 }
 0x101   : > { %v312_v20 = vsub.f32 %v299_v9, %v311_v19 }
 0x103   : > { %v313_v21 = vmul.f32 1.442695, %v312_v20 }
 0x105   : > { %602 = vpow2.f32 %v313_v21 }
 0x10f   : > { %v603_v22 = vpop.eup %602 }
 0x110   : > { %v315_v23 = vsel %vm304_vm2, %v603_v22, 0.0  ;;  %324 = vperm.xlu0 %597, %v603_v22  }
 0x111   : > { %v316_v24 = vrot.slane %v315_v23, 4 }
 0x113   : > { %v317_v25 = vadd.f32 %v316_v24, %v315_v23 }
 0x115   : > { %v318_v26 = vrot.slane %v317_v25, 2 }
 0x117   : > { %v319_v27 = vadd.f32 %v318_v26, %v317_v25 }
 0x119   : > { %v320_v34 = vrot.slane %v319_v27, 1 }
 0x11b   : > { %v321_v36 = vadd.f32 %v320_v34, %v319_v27 }
 0x11d   : > { %604 = vrcp.f32 %v321_v36 }
 0x127   : > { %v605_v37 = vpop.eup %604 }
 0x128   : > { %339 = vperm.xlu0 %597, %v605_v37  }
 0x18f   : > { %v325_v39 = vpop.permute.xlu0 %324 }
 0x190   : > { %v327_v40 = vmul.f32 %v325_v39, %v299_v9 }
 0x192   : > { %v329_v41 = vsel %vm328_vm4, %v327_v40, 0.0 }
 0x193   : > { %v330_v42 = vrot.slane %v329_v41, 4 }
 0x195   : > { %v331_v43 = vadd.f32 %v330_v42, %v329_v41 }
 0x197   : > { %v332_v44 = vrot.slane %v331_v43, 2 }
 0x199   : > { %v333_v45 = vadd.f32 %v332_v44, %v331_v43 }
 0x19b   : > { %v334_v46 = vrot.slane %v333_v45, 1 }
 0x19d   : > { %v335_v47 = vadd.f32 %v334_v46, %v333_v45 }
 0x1a7   : > { %v340_v48 = vpop.permute.xlu0 %339 }
 0x1a8   : > { %v342_v49 = vmul.f32 %v340_v48, %v335_v47 }
 0x1aa   : > { %546 = vmatmul.mubr.msk.f32.vlgmr.msra.gmra.mrb[0].mxu1 %vm328_vm4, %v342_v49 }
 0x27d   : > { %v422_v51 = vpop.f32.mrb[0].mxu1 }
 0x27e   : > { %v423_v52 = vadd.f32 %v422_v51, %v348_v50  ;;  %v547_v53 = vpop.f32.mrb[1].mxu1 }
 0x280   : > { %427 = vst.msk [vmem:[%s214_s23] sm:$0x1] %vm426_vm5, %v423_v52 }
 0x281   : > { %619 = shalt.err (!%p616_p3)
}
 0x282   : > { %s620_s11 = scalar_lea.hbm %s798_s6, 16  ;;  %s624_s14 = scalar_lea.hbm %s845_s5, 32 }
 0x283   : > { %p621_p4 = scmp.ne.s32.totalorder %s798_s6, %s620_s11  ;;  %p625_p9 = scmp.lt.u32.totalorder %s798_s6, %s845_s5 }
 0x284   : > { %p626_p10 = scmp.lt.u32.totalorder %s624_s14, %s620_s11  ;;  %p628_p12 = scmp.lt.u32.totalorder %s620_s11, %s798_s6 }
 0x285   : > { %p622_p7 = pnand %p621_p4, %p743_p5 }
 0x286   : > { %p627_p11 = por %p626_p10, %p625_p9 }
 0x287   : > { %p623_p8 = pneg %p622_p7 }
 0x288   : > { %p629_p13 = por %p628_p12, %p627_p11 }
 0x28a   : > { %p630_p0 = pnand %p629_p13, %p623_p8 }
 0x28c   : > { %633 = shalt.err (!%p630_p0)
}
 0x28d   : > { %554 = dma.vmem_to_hbm [thread:$0]  (%p743_p5), %s800_s25, 16, %s798_s6, %s429_s7  }
 0x28e PF: > { %p560_p1 = scmp.ge.s32.totalorder %s668_s21, 2  ;;  %s453_s17 = sand.u32 1, %s656_s18  }
 0x28f   : > { %s454_s23 = scalar_lea.sflag [#allocation3], %s453_s17 }
 0x290   : > { %p557_p2 = pnand %p560_p1, %p747_p6 }
 0x292   : > { %651 = dma.done.wait (!%p557_p2), %s454_s23, 16  }
 0x293   : > { %653 = vsyncadd (!%p557_p2), %s454_s23, 4294967280  ;;  %p15_p3 = scmp.ge.s32.totalorder %s730_s24, 4   ;;  %s848_s18 = smov %s660_s19 }
 0x294   : > { %s849_s19 = smov %s664_s20  ;;  %s850_s20 = smov %s741_s27 }
 0x295   : > { %s851_s21 = smov %s730_s24  ;;  %17 = sbr.rel (!%p15_p3) target bundleno = 3 (0x3), region = 75 }
 0x29c   :  { %458 = vsyncpa [#allocation3], 1 }
 0x29d   :  { %460 = vsyncpa [#allocation3 + $0x1], 1 }

</bundles_post_ra>
